<compile_context>
chip_gen: v7x
topology: tpu7x:2x2x1
jax: 0.10.0
libtpu: 0.0.40
codegen_flags: <defaults>
</compile_context>

<pallas_src>
import functools

import jax
import jax.numpy as jnp
from jax.experimental import pallas as pl
from jax.experimental.pallas import tpu as pltpu


def _round_up(x, m):
    return ((x + m - 1) // m) * m


# ----------------------------------------------------------------------------
# Kernel 1: fused model(x) -> {'feature': features, 'pred': y}
#   features = x_flat @ Wf^T + bf ;  y = features @ Wfc^T + bfc
# Tiled over (N, K); K is the reduction ("arbitrary") axis with an accumulator.
# ----------------------------------------------------------------------------
def _model_fc_kernel(x_ref, wf_ref, bf_ref, wfc_ref, bfc_ref,
                     feat_ref, logit_ref, acc_ref):
    k = pl.program_id(1)

    @pl.when(k == 0)
    def _():
        acc_ref[...] = jnp.zeros_like(acc_ref)

    # (TN, TK) x (A_pad, TK) contracted on trailing K axes -> (TN, A_pad)
    acc_ref[...] += jax.lax.dot_general(
        x_ref[...], wf_ref[...],
        dimension_numbers=(((1,), (1,)), ((), ())),
        preferred_element_type=jnp.float32)

    @pl.when(k == pl.num_programs(1) - 1)
    def _():
        f = acc_ref[...] + bf_ref[...]
        feat_ref[...] = f
        # (TN, A_pad) x (C_pad, A_pad) contracted on trailing A -> (TN, C_pad)
        logit_ref[...] = jax.lax.dot_general(
            f, wfc_ref[...],
            dimension_numbers=(((1,), (1,)), ((), ())),
            preferred_element_type=jnp.float32) + bfc_ref[...]


def model_fc_forward(x_p, wf_p, bf_p, wfc_p, bfc_p, tn, tk):
    n_pad, k_pad = x_p.shape
    a_pad = wf_p.shape[0]
    c_pad = wfc_p.shape[0]
    grid = (n_pad // tn, k_pad // tk)
    feat, logit = pl.pallas_call(
        _model_fc_kernel,
        out_shape=(jax.ShapeDtypeStruct((n_pad, a_pad), jnp.float32),
                   jax.ShapeDtypeStruct((n_pad, c_pad), jnp.float32)),
        grid_spec=pltpu.PrefetchScalarGridSpec(
            num_scalar_prefetch=0,
            grid=grid,
            in_specs=[pl.BlockSpec((tn, tk), lambda i, k: (i, k)),
                      pl.BlockSpec((a_pad, tk), lambda i, k: (0, k)),
                      pl.BlockSpec((1, a_pad), lambda i, k: (0, 0)),
                      pl.BlockSpec((c_pad, a_pad), lambda i, k: (0, 0)),
                      pl.BlockSpec((1, c_pad), lambda i, k: (0, 0))],
            out_specs=(pl.BlockSpec((tn, a_pad), lambda i, k: (i, 0)),
                       pl.BlockSpec((tn, c_pad), lambda i, k: (i, 0))),
            scratch_shapes=[pltpu.VMEM((tn, a_pad), jnp.float32)]),
        compiler_params=pltpu.CompilerParams(
            dimension_semantics=("parallel", "arbitrary")),
    )(x_p, wf_p, bf_p, wfc_p, bfc_p)
    return feat, logit


# ----------------------------------------------------------------------------
# Kernel 2: EstimatorCV.update_CV heavy part, fused.
#   Per class c: mask = (labels == c);  cnt; mean; M = mask*(feat - mean);
#   cov_temp[c] = M^T M / max(cnt, 1).  Features stay VMEM-resident across c.
# ----------------------------------------------------------------------------
def _class_stats_kernel(lbl_ref, f_ref, cov_ref, ave_ref, cnt_ref):
    c = pl.program_id(0)
    mask = (lbl_ref[...] == c).astype(jnp.float32)            # (N_pad, 1)
    feats = f_ref[...]                                        # (N_pad, A_pad)
    masked = feats * mask
    cnt = jnp.sum(mask)
    amt = jnp.maximum(cnt, 1.0)
    mean = jnp.sum(masked, axis=0, keepdims=True) / amt       # (1, A_pad)
    centered = masked - mean * mask                           # (N_pad, A_pad)
    outer = jax.lax.dot_general(                              # M^T @ M
        centered, centered,
        dimension_numbers=(((0,), (0,)), ((), ())),
        preferred_element_type=jnp.float32)
    cov_ref[0] = outer / amt
    ave_ref[0] = mean
    cnt_ref[...] = jnp.reshape(cnt, (1, 1, 1))


def class_stats(features_p, labels_col, class_num):
    n_pad, a_pad = features_p.shape
    cov_t, ave_t, cnt = pl.pallas_call(
        _class_stats_kernel,
        out_shape=(jax.ShapeDtypeStruct((class_num, a_pad, a_pad), jnp.float32),
                   jax.ShapeDtypeStruct((class_num, 1, a_pad), jnp.float32),
                   jax.ShapeDtypeStruct((class_num, 1, 1), jnp.float32)),
        grid=(class_num,),
        in_specs=[pl.BlockSpec((n_pad, 1), lambda c: (0, 0)),
                  pl.BlockSpec((n_pad, a_pad), lambda c: (0, 0))],
        out_specs=(pl.BlockSpec((1, a_pad, a_pad), lambda c: (c, 0, 0)),
                   pl.BlockSpec((1, 1, a_pad), lambda c: (c, 0, 0)),
                   pl.BlockSpec((1, 1, 1), lambda c: (c, 0, 0))),
        compiler_params=pltpu.CompilerParams(dimension_semantics=("parallel",)),
    )(labels_col, features_p)
    return cov_t, ave_t.reshape(class_num, a_pad), cnt.reshape(class_num)


def update_cv_pallas(cov_p, ave_p, amount, features_p, labels_col, class_num):
    """EMA bookkeeping mirrors the PyTorch code (NaN->0, zero-count->1)."""
    cov_temp, ave_cxa, sum_weight = class_stats(features_p, labels_col, class_num)
    weight_cv = sum_weight[:, None, None] / (sum_weight[:, None, None]
                                             + amount[:, None, None])
    weight_cv = jnp.where(jnp.isnan(weight_cv), 0.0, weight_cv)
    weight_av = sum_weight[:, None] / (sum_weight[:, None] + amount[:, None])
    weight_av = jnp.where(jnp.isnan(weight_av), 0.0, weight_av)

    diff = ave_p - ave_cxa
    additional = weight_cv * (1.0 - weight_cv) * (diff[:, :, None] * diff[:, None, :])

    new_cov = cov_p * (1.0 - weight_cv) + cov_temp * weight_cv + additional
    new_ave = ave_p * (1.0 - weight_av) + ave_cxa * weight_av
    new_amount = amount + sum_weight
    return new_cov, new_ave, new_amount


# ----------------------------------------------------------------------------
# Kernel 3a: per-class sigma table (lane-dense output).
#   sigma2[n, c] = (W_c - W_{y_n}) CV_{y_n} (W_c - W_{y_n})^T depends only on
#   (y_n, c), so compute S[k, c] for every class k once with full MXU matmuls.
#   The diag row-reduction is done via a ones-row MXU contraction so the
#   result is already a (1, C_pad) lane-major row -> unmasked stores.
# ----------------------------------------------------------------------------
def _class_sigma_kernel(w_ref, cv_ref, s_ref):
    k = pl.program_id(0)
    a_pad = w_ref.shape[1]
    w = w_ref[...]                                 # (C_pad, A_pad)
    wk = w_ref[pl.ds(k, 1), :]                     # (1, A_pad)  row of class k
    d = w - wk                                     # (C_pad, A_pad)
    t = jnp.dot(d, cv_ref[0], preferred_element_type=jnp.float32)
    prod = t * d                                   # (C_pad, A_pad)
    ones_row = jnp.ones((1, a_pad), jnp.float32)
    # diag(D CV D^T) as a lane-major row: (1, A_pad) x (C_pad, A_pad)^T -> (1, C_pad)
    s_row = jax.lax.dot_general(
        ones_row, prod,
        dimension_numbers=(((1,), (1,)), ((), ())),
        preferred_element_type=jnp.float32)
    s_ref[0] = s_row


def class_sigma(wfc_p, cov_p):
    class_num, a_pad, _ = cov_p.shape
    c_pad = wfc_p.shape[0]
    s = pl.pallas_call(
        _class_sigma_kernel,
        out_shape=jax.ShapeDtypeStruct((class_num, 1, c_pad), jnp.float32),
        grid=(class_num,),
        in_specs=[pl.BlockSpec((c_pad, a_pad), lambda k: (0, 0)),
                  pl.BlockSpec((1, a_pad, a_pad), lambda k: (k, 0, 0))],
        out_specs=pl.BlockSpec((1, 1, c_pad), lambda k: (k, 0, 0)),
        compiler_params=pltpu.CompilerParams(dimension_semantics=("parallel",)),
    )(wfc_p, cov_p)
    return s.reshape(class_num, c_pad)


# ----------------------------------------------------------------------------
# Kernel 3b: batched isda_aug + cross entropy (lane-dense, TB samples / step).
#   sigma2 = onehot(labels) @ S ; aug = y + 0.5*ratio*sigma2 ;
#   nll = logsumexp(aug[:real_C]) - aug[label]
# ----------------------------------------------------------------------------
def _aug_ce_kernel(half_ratio, c_real, lbl_ref, y_ref, s_ref, aug_ref, nll_ref):
    lbl = lbl_ref[...]                                           # (TB, 1) int32
    tb = y_ref.shape[0]
    c_pad = y_ref.shape[1]
    col = jax.lax.broadcasted_iota(jnp.int32, (tb, c_pad), 1)
    onehot = (col == lbl).astype(jnp.float32)                    # (TB, C_pad)
    sigma2 = jnp.dot(onehot, s_ref[...], preferred_element_type=jnp.float32)
    aug = y_ref[...] + half_ratio * sigma2
    aug_ref[...] = aug
    masked = jnp.where(col < c_real, aug, -1e30)                 # hide pad cols
    m = jnp.max(masked, axis=-1, keepdims=True)
    lse = m + jnp.log(jnp.sum(jnp.exp(masked - m), axis=-1, keepdims=True))
    picked = jnp.sum(onehot * aug, axis=-1, keepdims=True)
    nll_ref[...] = lse - picked


def isda_aug_and_ce(wfc_p, cov_p, y_p, labels_col, class_num, ratio):
    n_pad, c_pad = y_p.shape
    s2d = class_sigma(wfc_p, cov_p)                              # (C, C_pad)
    s_pad = jnp.zeros((c_pad, c_pad), jnp.float32).at[:class_num].set(s2d)
    tb = 128 if n_pad >= 128 else n_pad
    aug, nll = pl.pallas_call(
        functools.partial(_aug_ce_kernel, 0.5 * float(ratio), int(class_num)),
        out_shape=(jax.ShapeDtypeStruct((n_pad, c_pad), jnp.float32),
                   jax.ShapeDtypeStruct((n_pad, 1), jnp.float32)),
        grid=(n_pad // tb,),
        in_specs=[pl.BlockSpec((tb, 1), lambda i: (i, 0)),
                  pl.BlockSpec((tb, c_pad), lambda i: (i, 0)),
                  pl.BlockSpec((c_pad, c_pad), lambda i: (0, 0))],
        out_specs=(pl.BlockSpec((tb, c_pad), lambda i: (i, 0)),
                   pl.BlockSpec((tb, 1), lambda i: (i, 0))),
        compiler_params=pltpu.CompilerParams(dimension_semantics=("parallel",)),
    )(labels_col, y_p, s_pad)
    return aug, nll


# ----------------------------------------------------------------------------
# ISDALoss.forward (functional): returns (loss, y) plus aug logits / new state.
# All padding to TPU-friendly shapes happens here and is sliced off again.
# ----------------------------------------------------------------------------
def isda_forward(params, state, x, target, ratio):
    w_feat, b_feat, w_fc, b_fc = params
    cov, ave, amount = state
    N = x.shape[0]
    A, K = w_feat.shape
    C = w_fc.shape[0]

    # --- padded tile geometry -------------------------------------------------
    n8 = _round_up(N, 8)
    tn = 128 if n8 >= 128 else n8
    n_pad = _round_up(N, tn)
    a_pad = _round_up(A, 128)
    c_pad = _round_up(C, 128)
    tk = min(512, _round_up(K, 128))
    k_pad = _round_up(K, tk)

    # --- zero-pad operands ----------------------------------------------------
    x_flat = x.reshape(N, -1).astype(jnp.float32)
    x_p = jnp.pad(x_flat, ((0, n_pad - N), (0, k_pad - K)))
    wf_p = jnp.pad(w_feat, ((0, a_pad - A), (0, k_pad - K)))
    bf_p = jnp.pad(b_feat, (0, a_pad - A)).reshape(1, a_pad)
    wfc_p = jnp.pad(w_fc, ((0, c_pad - C), (0, a_pad - A)))
    bfc_p = jnp.pad(b_fc, (0, c_pad - C)).reshape(1, c_pad)
    lbl_p = jnp.pad(target.astype(jnp.int32), (0, n_pad - N),
                    constant_values=-1).reshape(n_pad, 1)
    cov_p = jnp.pad(cov, ((0, 0), (0, a_pad - A), (0, a_pad - A)))
    ave_p = jnp.pad(ave, ((0, 0), (0, a_pad - A)))

    # --- kernels ----------------------------------------------------------------
    feat_p, y_p = model_fc_forward(x_p, wf_p, bf_p, wfc_p, bfc_p, tn, tk)
    new_cov_p, new_ave_p, new_amount = update_cv_pallas(
        cov_p, ave_p, amount, feat_p, lbl_p, C)
    aug_p, nll = isda_aug_and_ce(wfc_p, new_cov_p, y_p, lbl_p, C, ratio)

    y = y_p[:N, :C]
    aug = aug_p[:N, :C]
    loss = jnp.mean(nll[:N, 0])
    new_state = (new_cov_p[:, :A, :A], new_ave_p[:, :A], new_amount)
    return loss, y, aug, new_state


# ----------------------------------------------------------------------------
# Pure-JAX reference (mirrors the PyTorch code 1:1) for a correctness check.
# ----------------------------------------------------------------------------
def _update_cv_ref(cov, ave, amount, features, labels, C):
    N, A = features.shape
    onehot = jax.nn.one_hot(labels, C, dtype=jnp.float32)
    feats_by_sort = features[:, None, :] * onehot[:, :, None]
    amount_cxa = jnp.broadcast_to(jnp.sum(onehot, axis=0)[:, None], (C, A))
    amount_cxa = jnp.where(amount_cxa == 0, 1.0, amount_cxa)
    ave_cxa = jnp.sum(feats_by_sort, axis=0) / amount_cxa
    var_temp = feats_by_sort - ave_cxa[None] * onehot[:, :, None]
    var_temp_cna = jnp.transpose(var_temp, (1, 0, 2))
    outer = jnp.einsum('cna,cnb->cab', var_temp_cna, var_temp_cna)
    var_temp_cov = outer / amount_cxa[:, :, None]
    sum_weight = jnp.sum(onehot, axis=0)
    weight_cv = sum_weight[:, None, None] / (sum_weight[:, None, None] + amount[:, None, None])
    weight_cv = jnp.where(jnp.isnan(weight_cv), 0.0, weight_cv)
    weight_av = sum_weight[:, None] / (sum_weight[:, None] + amount[:, None])
    weight_av = jnp.where(jnp.isnan(weight_av), 0.0, weight_av)
    diff = ave - ave_cxa
    additional = weight_cv * (1.0 - weight_cv) * (diff[:, :, None] * diff[:, None, :])
    new_cov = cov * (1.0 - weight_cv) + var_temp_cov * weight_cv + additional
    new_ave = ave * (1.0 - weight_av) + ave_cxa * weight_av
    new_amount = amount + sum_weight
    return new_cov, new_ave, new_amount


def isda_forward_ref(params, state, x, target, ratio):
    w_feat, b_feat, w_fc, b_fc = params
    cov, ave, amount = state
    N = x.shape[0]
    C = w_fc.shape[0]
    x_flat = x.reshape(N, -1)
    features = x_flat @ w_feat.T + b_feat
    y = features @ w_fc.T + b_fc
    cov, ave, amount = _update_cv_ref(cov, ave, amount, features, target, C)
    d = w_fc[None, :, :] - w_fc[target][:, None, :]
    cv_t = cov[target]
    sigma2 = ratio * jnp.einsum('nca,nab,ncb->nc', d, cv_t, d)
    aug = y + 0.5 * sigma2
    logp = jax.nn.log_softmax(aug, axis=-1)
    loss = -jnp.mean(logp[jnp.arange(N), target])
    return loss, y, aug, (cov, ave, amount)


if __name__ == "__main__":
    key = jax.random.PRNGKey(0)
    N, Cin, H, W = 2, 4, 16, 16          # x: NCHW
    A, Ccls = 32, 8                       # feature_num, class_num
    ratio = 0.5
    K = Cin * H * W

    k1, k2, k3, k4, k5 = jax.random.split(key, 5)
    x = jax.random.normal(k1, (N, Cin, H, W), dtype=jnp.float32)
    target_x = jax.random.randint(k2, (N,), 0, Ccls, dtype=jnp.int32)

    # Deterministic synthetic parameters (model + fc); EstimatorCV state = zeros.
    w_feat = 0.05 * jax.random.normal(k3, (A, K), dtype=jnp.float32)
    b_feat = 0.01 * jax.random.normal(k5, (A,), dtype=jnp.float32)
    w_fc = 0.1 * jax.random.normal(k4, (Ccls, A), dtype=jnp.float32)
    b_fc = jnp.zeros((Ccls,), dtype=jnp.float32)
    params = (w_feat, b_feat, w_fc, b_fc)
    state = (jnp.zeros((Ccls, A, A), jnp.float32),
             jnp.zeros((Ccls, A), jnp.float32),
             jnp.zeros((Ccls,), jnp.float32))

    loss, y, aug, new_state = isda_forward(params, state, x, target_x, ratio)
    jax.block_until_ready((loss, y, aug, new_state))

    loss_r, y_r, aug_r, state_r = isda_forward_ref(params, state, x, target_x, ratio)
    assert jnp.allclose(y, y_r, rtol=1e-2, atol=1e-2), "pred mismatch"
    assert jnp.allclose(aug, aug_r, rtol=1e-2, atol=1e-2), "isda_aug mismatch"
    assert jnp.allclose(loss, loss_r, rtol=1e-2, atol=1e-2), "loss mismatch"
    assert jnp.allclose(new_state[0], state_r[0], rtol=1e-2, atol=1e-2), "cov mismatch"
    assert jnp.allclose(new_state[1], state_r[1], rtol=1e-2, atol=1e-2), "ave mismatch"
    assert jnp.allclose(new_state[2], state_r[2], rtol=1e-2, atol=1e-2), "amount mismatch"

    print("KERNEL_OK")
</pallas_src>

<mosaic_0001>
module attributes {stable_mosaic.version = 11 : i64} {
  func.func @_model_fc_kernel(%arg0: i32, %arg1: i32, %arg2: memref<8x512xf32, #tpu.memory_space<vmem>>, %arg3: memref<128x512xf32, #tpu.memory_space<vmem>>, %arg4: memref<1x128xf32, #tpu.memory_space<vmem>>, %arg5: memref<128x128xf32, #tpu.memory_space<vmem>>, %arg6: memref<1x128xf32, #tpu.memory_space<vmem>>, %arg7: memref<8x128xf32, #tpu.memory_space<vmem>>, %arg8: memref<8x128xf32, #tpu.memory_space<vmem>>, %arg9: memref<8x128xf32, #tpu.memory_space<vmem>>) attributes {dimension_semantics = [#tpu.dimension_semantics<parallel>, #tpu.dimension_semantics<arbitrary>], iteration_bounds = array<i64: 1, 2>, scalar_prefetch = 0 : i64, scratch_operands = 1 : i64, tpu.core_type = #tpu.core_type<tc>, window_params = [{transform_indices = @transform_0, window_bounds = array<i64: 8, 512>}, {transform_indices = @transform_1, window_bounds = array<i64: 128, 512>}, {pipeline_mode = #tpu.pipeline_mode<synchronous>, transform_indices = @transform_2, window_bounds = array<i64: 1, 128>}, {pipeline_mode = #tpu.pipeline_mode<synchronous>, transform_indices = @transform_3, window_bounds = array<i64: 128, 128>}, {pipeline_mode = #tpu.pipeline_mode<synchronous>, transform_indices = @transform_4, window_bounds = array<i64: 1, 128>}, {transform_indices = @transform_5, window_bounds = array<i64: 8, 128>}, {transform_indices = @transform_6, window_bounds = array<i64: 8, 128>}]} {
    %c0_i32 = arith.constant 0 : i32
    %0 = arith.cmpi eq, %arg1, %c0_i32 : i32
    %1 = arith.extui %0 : i1 to i32
    %c0_i32_0 = arith.constant 0 : i32
    %2 = arith.cmpi ne, %1, %c0_i32_0 : i32
    scf.if %2 {
      %cst_9 = arith.constant 0.000000e+00 : f32
      %12 = vector.broadcast %cst_9 : f32 to vector<8x128xf32>
      %c0_10 = arith.constant 0 : index
      %c0_11 = arith.constant 0 : index
      %13 = vector.load %arg9[%c0_10, %c0_11] : memref<8x128xf32, #tpu.memory_space<vmem>>, vector<8x128xf32>
      tpu.vector_store %arg9[%c0_10, %c0_11], %12 {strides = array<i32>} : memref<8x128xf32, #tpu.memory_space<vmem>>, vector<8x128xf32>,
    } else {
    }
    %c0 = arith.constant 0 : index
    %c0_1 = arith.constant 0 : index
    %3 = vector.load %arg9[%c0, %c0_1] : memref<8x128xf32, #tpu.memory_space<vmem>>, vector<8x128xf32>
    %c0_2 = arith.constant 0 : index
    %c0_3 = arith.constant 0 : index
    %4 = vector.load %arg2[%c0_2, %c0_3] : memref<8x512xf32, #tpu.memory_space<vmem>>, vector<8x512xf32>
    %c0_4 = arith.constant 0 : index
    %c0_5 = arith.constant 0 : index
    %5 = vector.load %arg3[%c0_4, %c0_5] : memref<128x512xf32, #tpu.memory_space<vmem>>, vector<128x512xf32>
    %cst = arith.constant dense<0.000000e+00> : vector<8x128xf32>
    %6 = tpu.matmul %4, %5, %cst {dimension_numbers = #tpu.dot_dimension_numbers<[1], [1], [0], [0], [0, 0, 1, 0], [], []>} : vector<8x512xf32>, vector<128x512xf32>, vector<8x128xf32> -> vector<8x128xf32>
    %7 = arith.addf %3, %6 : vector<8x128xf32>
    %c0_6 = arith.constant 0 : index
    %c0_7 = arith.constant 0 : index
    %8 = vector.load %arg9[%c0_6, %c0_7] : memref<8x128xf32, #tpu.memory_space<vmem>>, vector<8x128xf32>
    tpu.vector_store %arg9[%c0_6, %c0_7], %7 {strides = array<i32>} : memref<8x128xf32, #tpu.memory_space<vmem>>, vector<8x128xf32>,
    %c1_i32 = arith.constant 1 : i32
    %9 = arith.cmpi eq, %arg1, %c1_i32 : i32
    %10 = arith.extui %9 : i1 to i32
    %c0_i32_8 = arith.constant 0 : i32
    %11 = arith.cmpi ne, %10, %c0_i32_8 : i32
    scf.if %11 {
      %c0_9 = arith.constant 0 : index
      %c0_10 = arith.constant 0 : index
      %12 = vector.load %arg9[%c0_9, %c0_10] : memref<8x128xf32, #tpu.memory_space<vmem>>, vector<8x128xf32>
      %c0_11 = arith.constant 0 : index
      %c0_12 = arith.constant 0 : index
      %13 = vector.load %arg4[%c0_11, %c0_12] : memref<1x128xf32, #tpu.memory_space<vmem>>, vector<1x128xf32>
      %14 = vector.broadcast %13 : vector<1x128xf32> to vector<8x128xf32>
      %15 = arith.addf %12, %14 : vector<8x128xf32>
      %c0_13 = arith.constant 0 : index
      %c0_14 = arith.constant 0 : index
      %16 = vector.load %arg7[%c0_13, %c0_14] : memref<8x128xf32, #tpu.memory_space<vmem>>, vector<8x128xf32>
      tpu.vector_store %arg7[%c0_13, %c0_14], %15 {strides = array<i32>} : memref<8x128xf32, #tpu.memory_space<vmem>>, vector<8x128xf32>,
      %c0_15 = arith.constant 0 : index
      %c0_16 = arith.constant 0 : index
      %17 = vector.load %arg5[%c0_15, %c0_16] : memref<128x128xf32, #tpu.memory_space<vmem>>, vector<128x128xf32>
      %cst_17 = arith.constant dense<0.000000e+00> : vector<8x128xf32>
      %18 = tpu.matmul %15, %17, %cst_17 {dimension_numbers = #tpu.dot_dimension_numbers<[1], [1], [0], [0], [0, 0, 1, 0], [], []>} : vector<8x128xf32>, vector<128x128xf32>, vector<8x128xf32> -> vector<8x128xf32>
      %c0_18 = arith.constant 0 : index
      %c0_19 = arith.constant 0 : index
      %19 = vector.load %arg6[%c0_18, %c0_19] : memref<1x128xf32, #tpu.memory_space<vmem>>, vector<1x128xf32>
      %20 = vector.broadcast %19 : vector<1x128xf32> to vector<8x128xf32>
      %21 = arith.addf %18, %20 : vector<8x128xf32>
      %c0_20 = arith.constant 0 : index
      %c0_21 = arith.constant 0 : index
      %22 = vector.load %arg8[%c0_20, %c0_21] : memref<8x128xf32, #tpu.memory_space<vmem>>, vector<8x128xf32>
      tpu.vector_store %arg8[%c0_20, %c0_21], %21 {strides = array<i32>} : memref<8x128xf32, #tpu.memory_space<vmem>>, vector<8x128xf32>,
    } else {
    }
    return
  }
  func.func @transform_0(%arg0: i32, %arg1: i32) -> (i32, i32) {
    %c0_i32 = arith.constant 0 : i32
    return %arg0, %arg1 : i32, i32
  }
  func.func @transform_1(%arg0: i32, %arg1: i32) -> (i32, i32) {
    %c0_i32 = arith.constant 0 : i32
    %c0_i32_0 = arith.constant 0 : i32
    return %c0_i32, %arg1 : i32, i32
  }
  func.func @transform_2(%arg0: i32, %arg1: i32) -> (i32, i32) {
    %c0_i32 = arith.constant 0 : i32
    %c0_i32_0 = arith.constant 0 : i32
    %c0_i32_1 = arith.constant 0 : i32
    return %c0_i32, %c0_i32_0 : i32, i32
  }
  func.func @transform_3(%arg0: i32, %arg1: i32) -> (i32, i32) {
    %c0_i32 = arith.constant 0 : i32
    %c0_i32_0 = arith.constant 0 : i32
    %c0_i32_1 = arith.constant 0 : i32
    return %c0_i32, %c0_i32_0 : i32, i32
  }
  func.func @transform_4(%arg0: i32, %arg1: i32) -> (i32, i32) {
    %c0_i32 = arith.constant 0 : i32
    %c0_i32_0 = arith.constant 0 : i32
    %c0_i32_1 = arith.constant 0 : i32
    return %c0_i32, %c0_i32_0 : i32, i32
  }
  func.func @transform_5(%arg0: i32, %arg1: i32) -> (i32, i32) {
    %c0_i32 = arith.constant 0 : i32
    %c0_i32_0 = arith.constant 0 : i32
    return %arg0, %c0_i32 : i32, i32
  }
  func.func @transform_6(%arg0: i32, %arg1: i32) -> (i32, i32) {
    %c0_i32 = arith.constant 0 : i32
    %c0_i32_0 = arith.constant 0 : i32
    return %arg0, %c0_i32 : i32, i32
  }
}

</mosaic_0001>

<bundles_post_ra>
// kernel: tpu_custom_call.1
= control target key start
LH: loop header
LB: loop body
LE: loop exit
PB: predicated region body
PF: predicated region fallthrough
CT: control target
= control target key end

     0   :  { %s1640_s0 = inlined_call_operand.hbm [shape: f32[8,1024], index: 0, kind: input, shape index: {}]   ;;  %s1641_s1 = inlined_call_operand.hbm [shape: f32[128,1024], index: 1, kind: input, shape index: {}]   ;;  %s1642_s2 = inlined_call_operand.vmem [shape: f32[1,128], index: 2, kind: input, shape index: {}]   ;;  %s1643_s3 = inlined_call_operand.hbm [shape: f32[128,128], index: 3, kind: input, shape index: {}]   ;;  %s1644_s4 = inlined_call_operand.vmem [shape: f32[1,128], index: 4, kind: input, shape index: {}]   ;;  %s1645_s5 = inlined_call_operand.hbm [shape: f32[8,128], index: 5, kind: output, shape index: {0}]   ;;  %s1646_s6 = inlined_call_operand.hbm [shape: f32[8,128], index: 6, kind: output, shape index: {1}]  }
   0x1   :  { %1650 = sst [smem:[#allocation17_spill]] %s1640_s0 }
   0x2   :  { %12 = vsyncpa [#allocation4], 0 }
   0x3   :  { %14 = vsyncpa [#allocation4 + $0x1], 0 }
   0x4   :  { %15 = vsyncpa [#allocation7], 0 }
   0x5   :  { %17 = vsyncpa [#allocation7 + $0x1], 0 }
   0x6   :  { %18 = vsyncpa [#allocation5], 0 }
   0x7   :  { %19 = vsyncpa [#allocation11], 0  ;;  %s1309_s21 = smov 0   ;;  %s1311_s22 = smov 0  }
   0x8   :  { %s1313_s23 = smov 0   ;;  %s1315_s24 = smov 0  }
   0x9   :  { %s1317_s25 = smov 0   ;;  %s1319_s26 = smov 0  }
   0xa LB: > { %s1338_s27 = sadd.s32 4294967295, %s1258_s26   ;;  %p59_p0 = scmp.ne.s32.totalorder %s1242_s22, %s1238_s21  ;;  %s1258_s26 = sphi %s1319_s26, %s25_s26   ;;  %s1254_s25 = sphi %s1317_s25, %s1664_s25   ;;  %s1250_s24 = sphi %s1315_s24, %s1663_s24   ;;  %s1246_s23 = sphi %s1313_s23, %s1662_s23   ;;  %s1242_s22 = sphi %s1311_s22, %s1661_s22   ;;  %s1238_s21 = sphi %s1309_s21, %s1660_s21  }
   0xb   : > { %p1647_p1 = scmp.eq.s32.totalorder %s1338_s27, 0  ;;  %p793_p2 = scmp.ge.s32.totalorder %s1258_s26, 1 }
   0xc   : > { %p211_p3 = scmp.lt.s32.totalorder %s1258_s26, 3  ;;  %s1260_s30 = smov [#allocation8]  }
   0xd   : > { %p1346_p4 = por %p1647_p1, %p59_p0  ;;  %s226_s7 = sshll.u32 %s1260_s30, 4  ;;  %s227_s7 = int_to_ptr.vmem [resolvable:$true] %s226_s7 }
   0xe   : > { %p1350_p5 = pnand %p793_p2, %p211_p3  ;;  %s34_s9 = sadd.s32 1, %s1254_s25 }
   0xf   : > { %s1651_s28 = scalar_select %p1346_p4, 1, 0 }
  0x10   : > { %s1652_s29 = scalar_select %p1350_p5, 1, 0 }
  0x11   : > { %p974_p6 = pneg %p1350_p5  ;;  %s1052_s12 = scalar_lea.hbm %s1643_s3, 2048 }
  0x12   : > { %p1053_p8 = scmp.ne.s32.totalorder %s1643_s3, %s1052_s12  ;;  %p1059_p12 = scmp.lt.u32.totalorder %s1052_s12, %s1643_s3 }
  0x13   : > { %p1358_p7 = pnand %p974_p6, %p1647_p1 }
  0x15   : > { %p1054_p9 = pneg %p1358_p7 }
  0x17   : > { %p1055_p10 = pnand %p1054_p9, %p1053_p8 }
  0x19   : > { %p1056_p11 = pneg %p1055_p10 }
  0x1b   : > { %p1061_p13 = pnand %p1059_p12, %p1056_p11 }
  0x1d   : > { %1064 = shalt.err (!%p1061_p13)
}
  0x1e   : > { %s1065_s17 = scalar_lea.vmem %s227_s7, 2048  ;;  %p1073_p6 = scmp.lt.s32.totalorder %s227_s7, %s227_s7 }
  0x1f   : > { %p1066_p0 = scmp.ne.s32.totalorder %s227_s7, %s1065_s17  ;;  %p1074_p1 = scmp.lt.s32.totalorder %s1065_s17, %s1065_s17 }
  0x21   : > { %p1068_p2 = pnand %p1066_p0, %p1054_p9  ;;  %p1075_p4 = por %p1074_p1, %p1073_p6 }
  0x23   : > { %p1069_p3 = pneg %p1068_p2 }
  0x25   : > { %p1076_p5 = pnand %p1075_p4, %p1069_p3 }
  0x27   : > { %1079 = shalt.err (!%p1076_p5)
}
  0x28   : > { %s1261_s18 = smov 128   ;;  %s1262_s19 = smov 8  }
  0x29   : > { %977 = dma.hbm_to_vmem [thread:$0]  (!%p1358_p7), %s1643_s3, 2048, %s227_s7, [#allocation7], %s1261_s18, %s1261_s18, %s1262_s19  }
  0x2a   : > { %p35_p1 = scmp.ge.s32.totalorder %s34_s9, 2  ;;  %s46_s30 = sadd.s32 1, %s1246_s23 }
  0x2b   : > { %p53_p4 = scmp.ne.s32.totalorder %s1246_s23, %s1242_s22  ;;  %p54_p5 = scmp.eq.s32.totalorder %s1258_s26, 0 }
  0x2c   : > { %s1666_s9 = smov (%p35_p1, %s34_s9), 0  ;;  %p986_p9 = scmp.lt.s32.totalorder %s1258_s26, 2 }
  0x2d   : > { %p55_p8 = por %p54_p5, %p53_p4  ;;  %s42_s10 = ssub.s32 %s1254_s25, %s1666_s9 }
  0x2e   : > { %s1389_s11 = sand.u32 1, %s1246_s23   ;;  %p44_p10 = scmp.eq.s32.totalorder %s42_s10, 0 }
  0x2f   : > { %s796_s8 = sshll.u32 %s1389_s11, 5  ;;  %s816_s12 = sshll.u32 %s1254_s25, 9 }
  0x30   : > { %s1394_s13 = scalar_select %p44_p10, %s1246_s23, %s46_s30  }
  0x31   : > { %s1654_s0 = sld [smem:[#allocation17_spill]]  ;;  %s247_s16 = scalar_lea.vmem [#allocation3], %s796_s8 }
  0x32   : > { %s257_s17 = sshll.u32 %s247_s16, 4  ;;  %p1403_p7 = pnand %p986_p9, %p55_p8  ;;  %s1407_s17 = int_to_ptr.vmem [resolvable:$true] %s257_s17 }
  0x33   : > { %s799_s19 = sshll.u32 %s1389_s11, 9  ;;  %s244_s20 = scalar_lea.sflag [#allocation4], %s1389_s11 }
  0x34   : > { %p1082_p12 = pneg %p1403_p7 }
  0x37   : > { %s1401_s15 = scalar_lea.hbm %s1654_s0, %s816_s12  ;;  %s1085_s8 = scalar_lea.hbm %s1654_s0, 1024 }
  0x38   : > { %s1080_s21 = scalar_lea.hbm %s1401_s15, 512  ;;  %p1086_p2 = scmp.lt.u32.totalorder %s1401_s15, %s1654_s0 }
  0x39   : > { %p1081_p11 = scmp.ne.s32.totalorder %s1401_s15, %s1080_s21  ;;  %p1087_p3 = scmp.lt.u32.totalorder %s1085_s8, %s1080_s21 }
  0x3a   : > { %p1089_p1 = scmp.lt.u32.totalorder %s1080_s21, %s1401_s15 }
  0x3b   : > { %p1083_p13 = pnand %p1082_p12, %p1081_p11  ;;  %p1088_p6 = por %p1087_p3, %p1086_p2 }
  0x3d   : > { %p1084_p0 = pneg %p1083_p13  ;;  %p1090_p4 = por %p1089_p1, %p1088_p6 }
  0x3f   : > { %p1091_p5 = pnand %p1090_p4, %p1084_p0 }
  0x41   : > { %1094 = shalt.err (!%p1091_p5)
}
  0x42   : > { %s1095_s16 = scalar_lea.vmem %s1407_s17, 512  ;;  %s1263_s30 = smov [#allocation3]  }
  0x43   : > { %p1096_p8 = scmp.ne.s32.totalorder %s1407_s17, %s1095_s16  ;;  %s1100_s10 = sshll.u32 %s1263_s30, 4  ;;  %s1101_s10 = int_to_ptr.vmem [resolvable:$false] %s1100_s10 }
  0x44   : > { %s1102_s7 = scalar_lea.vmem %s1101_s10, 1024  ;;  %p1103_p11 = scmp.lt.s32.totalorder %s1407_s17, %s1101_s10 }
  0x45   : > { %p1098_p9 = pnand %p1096_p8, %p1082_p12  ;;  %p1104_p13 = scmp.lt.s32.totalorder %s1102_s7, %s1095_s16 }
  0x47   : > { %p1099_p10 = pneg %p1098_p9  ;;  %p1105_p2 = por %p1104_p13, %p1103_p11 }
  0x49   : > { %p1106_p3 = pnand %p1105_p2, %p1099_p10 }
  0x4b   : > { %1109 = shalt.err (!%p1106_p3)
}
  0x4c   : > { %981 = dma.hbm_to_vmem [thread:$0]  (!%p1403_p7), %s1401_s15, 512, %s1407_s17, %s244_s20  }
  0x4d   : > { %s1441_s14 = scalar_lea.hbm %s1641_s1, %s816_s12  ;;  %s268_s16 = scalar_lea.vmem [#allocation6], %s799_s19 }
  0x4e   : > { %s275_s30 = sshll.u32 %s268_s16, 4  ;;  %s264_s10 = sand.u32 1, %s1258_s26   ;;  %s1445_s30 = int_to_ptr.vmem [resolvable:$true] %s275_s30 }
  0x4f   : > { %s1448_s7 = scalar_lea.sflag [#allocation7], %s264_s10  ;;  %s1110_s0 = scalar_lea.hbm %s1441_s14, 8192 }
  0x50   : > { %p1111_p0 = scmp.ne.s32.totalorder %s1441_s14, %s1110_s0  ;;  %s1115_s11 = scalar_lea.hbm %s1641_s1, 16384 }
  0x51   : > { %p1116_p4 = scmp.lt.u32.totalorder %s1441_s14, %s1641_s1  ;;  %p1117_p5 = scmp.lt.u32.totalorder %s1115_s11, %s1110_s0 }
  0x52   : > { %p1113_p6 = pnand %p1111_p0, %p1082_p12  ;;  %p1119_p9 = scmp.lt.u32.totalorder %s1110_s0, %s1441_s14 }
  0x53   : > { %p1118_p8 = por %p1117_p5, %p1116_p4 }
  0x54   : > { %p1114_p1 = pneg %p1113_p6 }
  0x55   : > { %p1120_p10 = por %p1119_p9, %p1118_p8 }
  0x57   : > { %p1121_p11 = pnand %p1120_p10, %p1114_p1 }
  0x59   : > { %1124 = shalt.err (!%p1121_p11)
}
  0x5a   : > { %s1125_s19 = scalar_lea.vmem %s1445_s30, 8192  ;;  %s1264_s21 = smov [#allocation6]  }
  0x5b   : > { %p1126_p13 = scmp.ne.s32.totalorder %s1445_s30, %s1125_s19  ;;  %s1130_s8 = sshll.u32 %s1264_s21, 4  ;;  %s1131_s8 = int_to_ptr.vmem [resolvable:$false] %s1130_s8 }
  0x5c   : > { %s1132_s16 = scalar_lea.vmem %s1131_s8, 16384  ;;  %p1133_p0 = scmp.lt.s32.totalorder %s1445_s30, %s1131_s8 }
  0x5d   : > { %p1128_p2 = pnand %p1126_p13, %p1082_p12  ;;  %p1134_p6 = scmp.lt.s32.totalorder %s1132_s16, %s1125_s19 }
  0x5f   : > { %p1129_p3 = pneg %p1128_p2  ;;  %p1135_p4 = por %p1134_p6, %p1133_p0 }
  0x61   : > { %p1136_p5 = pnand %p1135_p4, %p1129_p3 }
  0x63   : > { %1139 = shalt.err (!%p1136_p5)
}
  0x64   : > { %s1265_s0 = smov 1024   ;;  %s1266_s10 = smov 512  }
  0x65   : > { %s1267_s12 = smov 32   ;;  %p1656_p12 = scmp.ne.s32.totalorder %s1652_s29, 0 }
  0x66   : > { %984 = dma.hbm_to_vmem [thread:$0]  (!%p1403_p7), %s1441_s14, 8192, %s1445_s30, %s1448_s7, %s1265_s0, %s1266_s10, %s1267_s12  }
  0x67   : > { %287 = sbr.rel (%p1656_p12) target bundleno = 684 (0x2ac), region = 40  ;;  %s289_s15 = sand.u32 (!%p1656_p12), 1, %s1242_s22  }
  0x68   : > { %s803_s11 = sshll.u32 (!%p1656_p12), %s289_s15, 5  ;;  %s290_s17 = scalar_lea.sflag (!%p1656_p12), [#allocation4], %s289_s15 }
  0x69   : > { %s1477_s20 = scalar_lea.vmem (!%p1656_p12), [#allocation3], %s803_s11  ;;  %p1657_p1 = scmp.ne.s32.totalorder (!%p1656_p12), %s1651_s28, 0 }
  0x6e   : > { %1217 = dma.done.wait (%p1657_p1), %s290_s17, 512  }
  0x6f   : > { %1219 = vsyncadd (%p1657_p1), %s290_s17, 4294966784  ;;  %s298_s19 = sand.u32 1, %s1338_s27   ;;  %s804_s18 = sshll.u32 %s289_s15, 9 }
  0x70   : > { %s299_s14 = scalar_lea.sflag [#allocation7], %s298_s19  ;;  %s1484_s30 = scalar_lea.vmem [#allocation6], %s804_s18 }
  0x71   : > { %1221 = dma.done.wait (%p1657_p1), %s299_s14, 8192  }
  0x72   : > { %1223 = vsyncadd (%p1657_p1), %s299_s14, 4294959104  ;;  %p1658_p7 = scmp.eq.s32.totalorder %s1338_s27, 0 }
  0x74   : > { %1225 = dma.done.wait (%p1658_p7), [#allocation7], 2048   ;;  %p1659_p8 = pmov %p1658_p7 }
  0x75   : > { %p806_p9 = scmp.ne.s32.totalorder %s1250_s24, 0 }
  0x76   : > { %1227 = vsyncadd (%p1659_p8), [#allocation7], 4294965248  ;;  %v1268_v0 = vmov (!%p806_p9), 0.0  }
  0x77   : > { %340 = sbr.rel (%p806_p9) target bundleno = 126 (0x7e), region = 56  ;;  %341 = vst [vmem:[#allocation2] sm:$0xff] (!%p806_p9), %v1268_v0 }
  0x7e PF: > { %v348_v1 = vld [vmem:[%s1484_s30 + $0x8] sm:$0xff]  ;;  %v350_v3 = vld [vmem:[%s1484_s30 + $0x18] sm:$0xff]  ;;  %v347_v6 = vld [vmem:[%s1484_s30] sm:$0xff]  ;;  %p807_p10 = scmp.ne.s32.totalorder %s1250_s24, 1 }
  0x7f   : > { %v352_v2 = vld [vmem:[%s1484_s30 + $0x28] sm:$0xff]  ;;  %v354_v5 = vld [vmem:[%s1484_s30 + $0x38] sm:$0xff]  ;;  %v351_v7 = vld [vmem:[%s1484_s30 + $0x20] sm:$0xff]  ;;  %vm1270_vm0 = vmmov (!%p807_p10), 0  }
  0x80   : > { %v870_v4 = vpack.c.bf16 %v352_v2, %v348_v1  ;;  %v902_v8 = vpack.c.bf16 %v354_v5, %v350_v3  ;;  %v872_v9 = vpack.c.bf16 %v351_v7, %v347_v6  ;;  %v349_v10 = vld [vmem:[%s1484_s30 + $0x10] sm:$0xff]  ;;  %v356_v12 = vld [vmem:[%s1484_s30 + $0x48] sm:$0xff]  ;;  %v358_v15 = vld [vmem:[%s1484_s30 + $0x58] sm:$0xff] }
  0x81   : > { %v353_v11 = vld [vmem:[%s1484_s30 + $0x30] sm:$0xff]  ;;  %v360_v14 = vld [vmem:[%s1484_s30 + $0x68] sm:$0xff]  ;;  %v362_v16 = vld [vmem:[%s1484_s30 + $0x78] sm:$0xff] }
  0x82   : > { %871 = vmatprep.subr.bf16.mxu0 %v870_v4  ;;  %v904_v13 = vpack.c.bf16 %v353_v11, %v349_v10  ;;  %903 = vmatprep.subr.bf16.mxu1 %v902_v8  ;;  %v874_v17 = vpack.c.bf16 %v360_v14, %v356_v12  ;;  %v906_v18 = vpack.c.bf16 %v362_v16, %v358_v15  ;;  %v355_v19 = vld [vmem:[%s1484_s30 + $0x40] sm:$0xff]  ;;  %v357_v21 = vld [vmem:[%s1484_s30 + $0x50] sm:$0xff]  ;;  %v364_v23 = vld [vmem:[%s1484_s30 + $0x88] sm:$0xff] }
  0x83   : > { %873 = vmatpush1.bf16.xpose.msra.mxu0 %v872_v9  ;;  %v359_v20 = vld [vmem:[%s1484_s30 + $0x60] sm:$0xff]  ;;  %v361_v22 = vld [vmem:[%s1484_s30 + $0x70] sm:$0xff]  ;;  %v368_v24 = vld [vmem:[%s1484_s30 + $0xa8] sm:$0xff] }
  0x84   : > { %905 = vmatpush1.bf16.xpose.msra.mxu1 %v904_v13  ;;  %875 = vmatprep.subr.bf16.mxu0 %v874_v17  ;;  %v366_v25 = vld [vmem:[%s1484_s30 + $0x98] sm:$0xff]  ;;  %v876_v27 = vpack.c.bf16 %v359_v20, %v355_v19  ;;  %v908_v28 = vpack.c.bf16 %v361_v22, %v357_v21  ;;  %v878_v29 = vpack.c.bf16 %v368_v24, %v364_v23  ;;  %v363_v31 = vld [vmem:[%s1484_s30 + $0x80] sm:$0xff]  ;;  %v365_v33 = vld [vmem:[%s1484_s30 + $0x90] sm:$0xff] }
  0x85   : > { %907 = vmatprep.subr.bf16.mxu1 %v906_v18  ;;  %v370_v26 = vld [vmem:[%s1484_s30 + $0xb8] sm:$0xff]  ;;  %v367_v32 = vld [vmem:[%s1484_s30 + $0xa0] sm:$0xff]  ;;  %v369_v34 = vld [vmem:[%s1484_s30 + $0xb0] sm:$0xff] }
  0x86   : > { %v910_v30 = vpack.c.bf16 %v370_v26, %v366_v25  ;;  %v372_v35 = vld [vmem:[%s1484_s30 + $0xc8] sm:$0xff]  ;;  %v374_v37 = vld [vmem:[%s1484_s30 + $0xd8] sm:$0xff]  ;;  %v880_v39 = vpack.c.bf16 %v367_v32, %v363_v31  ;;  %v912_v40 = vpack.c.bf16 %v369_v34, %v365_v33  ;;  %v371_v43 = vld [vmem:[%s1484_s30 + $0xc0] sm:$0xff] }
  0x87   : > { %v376_v36 = vld [vmem:[%s1484_s30 + $0xe8] sm:$0xff]  ;;  %v378_v38 = vld [vmem:[%s1484_s30 + $0xf8] sm:$0xff]  ;;  %v375_v44 = vld [vmem:[%s1484_s30 + $0xe0] sm:$0xff] }
  0x88   : > { %v882_v41 = vpack.c.bf16 %v376_v36, %v372_v35  ;;  %v914_v42 = vpack.c.bf16 %v378_v38, %v374_v37  ;;  %v373_v45 = vld [vmem:[%s1484_s30 + $0xd0] sm:$0xff]  ;;  %v344_v46 = vld [vmem:[%s1477_s20 + $0x8] sm:$0xff]  ;;  %v346_v47 = vld [vmem:[%s1477_s20 + $0x18] sm:$0xff]  ;;  %v884_v53 = vpack.c.bf16 %v375_v44, %v371_v43 }
  0x89   : > { %v377_v48 = vld [vmem:[%s1484_s30 + $0xf0] sm:$0xff]  ;;  %v380_v49 = vld [vmem:[%s1484_s30 + $0x108] sm:$0xff]  ;;  %475 = vmatprep.mubr.f32.mxu0 %v344_v46  ;;  %v382_v51 = vld [vmem:[%s1484_s30 + $0x118] sm:$0xff]  ;;  %545 = vmatprep.mubr.f32.mxu1 %v346_v47  ;;  %v1269_v46 = vmov (!%p807_p10), 0.0|0.0  }
  0x8a   : > { %v384_v50 = vld [vmem:[%s1484_s30 + $0x128] sm:$0xff]  ;;  %v386_v52 = vld [vmem:[%s1484_s30 + $0x138] sm:$0xff]  ;;  %v916_v54 = vpack.c.bf16 %v377_v48, %v373_v45  ;;  %v379_v57 = vld [vmem:[%s1484_s30 + $0x100] sm:$0xff]  ;;  %v1271_v48 = vmov (!%p807_p10), 0.0  }
  0x8b   : > { %877 = vmatpush1.bf16.xpose.msra.mxu0 %v876_v27  ;;  %v886_v55 = vpack.c.bf16 %v384_v50, %v380_v49  ;;  %v918_v56 = vpack.c.bf16 %v386_v52, %v382_v51  ;;  %v383_v58 = vld [vmem:[%s1484_s30 + $0x120] sm:$0xff]  ;;  %v381_v59 = vld [vmem:[%s1484_s30 + $0x110] sm:$0xff]  ;;  %v388_v61 = vld [vmem:[%s1484_s30 + $0x148] sm:$0xff] }
  0x8c   : > { %909 = vmatpush1.bf16.xpose.msra.mxu1 %v908_v28  ;;  %879 = vmatprep.subr.bf16.mxu0 %v878_v29  ;;  %v385_v60 = vld [vmem:[%s1484_s30 + $0x130] sm:$0xff]  ;;  %v392_v62 = vld [vmem:[%s1484_s30 + $0x168] sm:$0xff]  ;;  %v390_v63 = vld [vmem:[%s1484_s30 + $0x158] sm:$0xff]  ;;  %v888_v1 = vpack.c.bf16 %v383_v58, %v379_v57 }
  0x8d   : > { %911 = vmatprep.subr.bf16.mxu1 %v910_v30  ;;  %v394_v0 = vld [vmem:[%s1484_s30 + $0x178] sm:$0xff]  ;;  %v920_v2 = vpack.c.bf16 %v385_v60, %v381_v59  ;;  %v890_v3 = vpack.c.bf16 %v392_v62, %v388_v61  ;;  %v387_v5 = vld [vmem:[%s1484_s30 + $0x140] sm:$0xff]  ;;  %v389_v7 = vld [vmem:[%s1484_s30 + $0x150] sm:$0xff] }
  0x8e   : > { %v922_v4 = vpack.c.bf16 %v394_v0, %v390_v63  ;;  %v391_v6 = vld [vmem:[%s1484_s30 + $0x160] sm:$0xff]  ;;  %v393_v8 = vld [vmem:[%s1484_s30 + $0x170] sm:$0xff]  ;;  %v396_v9 = vld [vmem:[%s1484_s30 + $0x188] sm:$0xff] }
  0x8f   : > { %v400_v10 = vld [vmem:[%s1484_s30 + $0x1a8] sm:$0xff]  ;;  %v398_v11 = vld [vmem:[%s1484_s30 + $0x198] sm:$0xff]  ;;  %v892_v13 = vpack.c.bf16 %v391_v6, %v387_v5  ;;  %v924_v14 = vpack.c.bf16 %v393_v8, %v389_v7  ;;  %v395_v17 = vld [vmem:[%s1484_s30 + $0x180] sm:$0xff] }
  0x90   : > { %v402_v12 = vld [vmem:[%s1484_s30 + $0x1b8] sm:$0xff]  ;;  %v894_v15 = vpack.c.bf16 %v400_v10, %v396_v9  ;;  %v399_v18 = vld [vmem:[%s1484_s30 + $0x1a0] sm:$0xff]  ;;  %v397_v19 = vld [vmem:[%s1484_s30 + $0x190] sm:$0xff] }
  0x91   : > { %v926_v16 = vpack.c.bf16 %v402_v12, %v398_v11  ;;  %v401_v20 = vld [vmem:[%s1484_s30 + $0x1b0] sm:$0xff]  ;;  %v404_v21 = vld [vmem:[%s1484_s30 + $0x1c8] sm:$0xff]  ;;  %v406_v23 = vld [vmem:[%s1484_s30 + $0x1d8] sm:$0xff]  ;;  %v896_v25 = vpack.c.bf16 %v399_v18, %v395_v17 }
  0x92   : > { %v408_v22 = vld [vmem:[%s1484_s30 + $0x1e8] sm:$0xff]  ;;  %v410_v24 = vld [vmem:[%s1484_s30 + $0x1f8] sm:$0xff]  ;;  %v928_v26 = vpack.c.bf16 %v401_v20, %v397_v19  ;;  %v403_v29 = vld [vmem:[%s1484_s30 + $0x1c0] sm:$0xff] }
  0x93   : > { %881 = vmatpush1.bf16.xpose.msra.mxu0 %v880_v39  ;;  %v898_v27 = vpack.c.bf16 %v408_v22, %v404_v21  ;;  %v930_v28 = vpack.c.bf16 %v410_v24, %v406_v23  ;;  %v407_v30 = vld [vmem:[%s1484_s30 + $0x1e0] sm:$0xff]  ;;  %v405_v31 = vld [vmem:[%s1484_s30 + $0x1d0] sm:$0xff]  ;;  %v342_v38 = vld [vmem:[#allocation2] sm:$0xff] }
  0x94   : > { %913 = vmatpush1.bf16.xpose.msra.mxu1 %v912_v40  ;;  %883 = vmatprep.subr.bf16.mxu0 %v882_v41  ;;  %v409_v32 = vld [vmem:[%s1484_s30 + $0x1f0] sm:$0xff]  ;;  %v900_v33 = vpack.c.bf16 %v407_v30, %v403_v29  ;;  %v343_v35 = vld [vmem:[%s1477_s20] sm:$0xff]  ;;  %v568_v45 = vld [vmem:[#allocation8 + $0x8] sm:$0xff] (!%p807_p10) }
  0x95   : > { %915 = vmatprep.subr.bf16.mxu1 %v914_v42  ;;  %v932_v34 = vpack.c.bf16 %v409_v32, %v405_v31  ;;  %v345_v36 = vld [vmem:[%s1477_s20 + $0x10] sm:$0xff]  ;;  %v567_v44 = vld [vmem:[#allocation8] sm:$0xff] (!%p807_p10)  ;;  %v570_v50 = vld [vmem:[#allocation8 + $0x18] sm:$0xff] (!%p807_p10) }
  0x96   : > { %v935_v47 = vpack.c.bf16 (!%p807_p10), %v568_v45, %v567_v44  ;;  %v569_v49 = vld [vmem:[#allocation8 + $0x10] sm:$0xff] (!%p807_p10)  ;;  %v808_v52 = vld [vmem:[%s1642_s2] ss:$0 sm:$0xff] (!%p807_p10)  ;;  %v575_v61 = vld [vmem:[#allocation8 + $0x40] sm:$0xff] (!%p807_p10) }
  0x97   : > { %v573_v58 = vld [vmem:[#allocation8 + $0x30] sm:$0xff] (!%p807_p10)  ;;  %v574_v59 = vld [vmem:[#allocation8 + $0x38] sm:$0xff] (!%p807_p10)  ;;  %v576_v62 = vld [vmem:[#allocation8 + $0x48] sm:$0xff] (!%p807_p10) }
  0x98   : > { %v944_v60 = vpack.c.bf16 (!%p807_p10), %v574_v59, %v573_v58  ;;  %v947_v63 = vpack.c.bf16 (!%p807_p10), %v576_v62, %v575_v61  ;;  %v577_v0 = vld [vmem:[#allocation8 + $0x50] sm:$0xff] (!%p807_p10)  ;;  %v582_v7 = vld [vmem:[#allocation8 + $0x78] sm:$0xff] (!%p807_p10) }
  0x99   : > { %v581_v6 = vld [vmem:[#allocation8 + $0x70] sm:$0xff] (!%p807_p10)  ;;  %v809_v9 = vld [vmem:[%s1644_s4] ss:$0 sm:$0xff] (!%p807_p10) }
  0x9a   : > { %v956_v8 = vpack.c.bf16 (!%p807_p10), %v582_v7, %v581_v6 }
  0x9b   : > { %885 = vmatpush1.bf16.xpose.msra.mxu0 %v884_v53 }
  0x9c   : > { %917 = vmatpush1.bf16.xpose.msra.mxu1 %v916_v54  ;;  %887 = vmatprep.subr.bf16.mxu0 %v886_v55  ;;  %v938_v54 = vpack.c.bf16 (!%p807_p10), %v570_v50, %v569_v49  ;;  %v571_v55 = vld [vmem:[#allocation8 + $0x20] sm:$0xff] (!%p807_p10) }
  0x9d   : > { %919 = vmatprep.subr.bf16.mxu1 %v918_v56  ;;  %v572_v56 = vld [vmem:[#allocation8 + $0x28] sm:$0xff] (!%p807_p10) }
  0x9e   : > { %v941_v57 = vpack.c.bf16 (!%p807_p10), %v572_v56, %v571_v55 }
  0xa3   : > { %889 = vmatpush1.bf16.xpose.msra.mxu0 %v888_v1  ;;  %v578_v1 = vld [vmem:[#allocation8 + $0x58] sm:$0xff] (!%p807_p10) }
  0xa4   : > { %921 = vmatpush1.bf16.xpose.msra.mxu1 %v920_v2  ;;  %891 = vmatprep.subr.bf16.mxu0 %v890_v3  ;;  %v950_v2 = vpack.c.bf16 (!%p807_p10), %v578_v1, %v577_v0  ;;  %v579_v3 = vld [vmem:[#allocation8 + $0x60] sm:$0xff] (!%p807_p10) }
  0xa5   : > { %923 = vmatprep.subr.bf16.mxu1 %v922_v4  ;;  %v580_v4 = vld [vmem:[#allocation8 + $0x68] sm:$0xff] (!%p807_p10) }
  0xa6   : > { %v953_v5 = vpack.c.bf16 (!%p807_p10), %v580_v4, %v579_v3 }
  0xab   : > { %893 = vmatpush1.bf16.xpose.msra.mxu0 %v892_v13 }
  0xac   : > { %925 = vmatpush1.bf16.xpose.msra.mxu1 %v924_v14  ;;  %895 = vmatprep.subr.bf16.mxu0 %v894_v15 }
  0xad   : > { %927 = vmatprep.subr.bf16.mxu1 %v926_v16 }
  0xb3   : > { %897 = vmatpush1.bf16.xpose.msra.mxu0 %v896_v25 }
  0xb4   : > { %929 = vmatpush1.bf16.xpose.msra.mxu1 %v928_v26  ;;  %899 = vmatprep.subr.bf16.mxu0 %v898_v27 }
  0xb5   : > { %931 = vmatprep.subr.bf16.mxu1 %v930_v28 }
  0xbb   : > { %901 = vmatpush1.bf16.xpose.msra.mxu0 %v900_v33 }
  0xbc   : > { %933 = vmatpush1.bf16.xpose.msra.mxu1 %v932_v34  ;;  %934 = vmatprep.subr.bf16.mxu0 (!%p807_p10), %v1269_v46 }
  0xc2   : > { %476 = vmatmul.mubr.f32.vlgmr.msra.gmra.mrb[0].mxu0 %v343_v35 }
  0xc3   : > { %546 = vmatmul.mubr.f32.vlgmr.msra.gmra.mrb[0].mxu1 %v345_v36  ;;  %867 = vmatprep.mubr.msk.f32.mxu0 (!%p807_p10), %vm1270_vm0, %v1271_v48 }
  0xc4   : > { %936 = vmatpush3.bf16.xpose.msra.mxu0 (!%p807_p10), %v935_v47 }
  0xc5   : > { %937 = vmatprep.subr.bf16.mxu0 (!%p807_p10), %v1269_v46 }
  0xcc   : > { %939 = vmatpush3.bf16.xpose.msra.mxu0 (!%p807_p10), %v938_v54 }
  0xcd   : > { %940 = vmatprep.subr.bf16.mxu0 (!%p807_p10), %v1269_v46 }
  0xd4   : > { %942 = vmatpush3.bf16.xpose.msra.mxu0 (!%p807_p10), %v941_v57 }
  0xd5   : > { %943 = vmatprep.subr.bf16.mxu0 (!%p807_p10), %v1269_v46 }
  0xdc   : > { %945 = vmatpush3.bf16.xpose.msra.mxu0 (!%p807_p10), %v944_v60 }
  0xdd   : > { %946 = vmatprep.subr.bf16.mxu0 (!%p807_p10), %v1269_v46 }
  0xe4   : > { %948 = vmatpush3.bf16.xpose.msra.mxu0 (!%p807_p10), %v947_v63 }
  0xe5   : > { %949 = vmatprep.subr.bf16.mxu0 (!%p807_p10), %v1269_v46 }
  0xec   : > { %951 = vmatpush3.bf16.xpose.msra.mxu0 (!%p807_p10), %v950_v2 }
  0xed   : > { %952 = vmatprep.subr.bf16.mxu0 (!%p807_p10), %v1269_v46 }
  0xf4   : > { %954 = vmatpush3.bf16.xpose.msra.mxu0 (!%p807_p10), %v953_v5 }
  0xf5   : > { %955 = vmatprep.subr.bf16.mxu0 (!%p807_p10), %v1269_v46 }
  0xfc   : > { %957 = vmatpush3.bf16.xpose.msra.mxu0 (!%p807_p10), %v956_v8 }
 0x195   : > { %v477_v37 = vpop.f32.mrb[0].mxu0  ;;  %556 = sbr.rel (%p807_p10) target bundleno = 636 (0x27c), region = 60 }
 0x196   : > { %v547_v39 = vpop.f32.mrb[0].mxu1  ;;  %v479_v40 = vpop.f32.mrb[1].mxu0 }
 0x197   : > { %v548_v41 = vadd.f32 %v547_v39, %v477_v37  ;;  %v549_v42 = vpop.f32.mrb[1].mxu1 }
 0x199   : > { %v551_v43 = vadd.f32 %v548_v41, %v342_v38 }
 0x19b   : > { %552 = vst [vmem:[#allocation2] sm:$0xff] %v551_v43 }
 0x1a2   : > { %v557_v51 = vld [vmem:[#allocation2] sm:$0xff] }
 0x1a3   : > { %v565_v53 = vadd.f32 %v808_v52, %v557_v51 }
 0x1a5   : > { %566 = vst [vmem:[#allocation9] sm:$0xff] %v565_v53  ;;  %868 = vmatmul.mubr.f32.vlgmr.msra.gmra.mrb[0].mxu0 %v565_v53 }
 0x278   : > { %v656_v10 = vpop.f32.mrb[0].mxu0 }
 0x279   : > { %v657_v11 = vadd.f32 %v809_v9, %v656_v10  ;;  %v869_v12 = vpop.f32.mrb[1].mxu0 }
 0x27b   : > { %660 = vst [vmem:[#allocation10] sm:$0xff] %v657_v11 }
 0x27c PF: > { %p988_p11 = scmp.eq.s32.totalorder %s1338_s27, 1  ;;  %s1272_s21 = smov [#allocation9]  }
 0x27d   : > { %s670_s8 = sshll.u32 %s1272_s21, 4  ;;  %s1273_s16 = smov [#allocation10]   ;;  %s671_s8 = int_to_ptr.vmem [resolvable:$true] %s670_s8 }
 0x27e   : > { %s683_s0 = sshll.u32 %s1273_s16, 4  ;;  %s1140_s10 = scalar_lea.vmem %s671_s8, 128  ;;  %s1571_s0 = int_to_ptr.vmem [resolvable:$true] %s683_s0 }
 0x27f   : > { %p1141_p13 = scmp.ne.s32.totalorder %s671_s8, %s1140_s10  ;;  %p1147_p0 = scmp.lt.s32.totalorder %s671_s8, %s671_s8 }
 0x280   : > { %p1148_p6 = scmp.lt.s32.totalorder %s1140_s10, %s1140_s10 }
 0x281   : > { %p1142_p2 = pnand %p1141_p13, %p988_p11 }
 0x282   : > { %p1149_p4 = por %p1148_p6, %p1147_p0 }
 0x283   : > { %p1143_p3 = pneg %p1142_p2 }
 0x285   : > { %p1150_p5 = pnand %p1149_p4, %p1143_p3 }
 0x287   : > { %1153 = shalt.err (!%p1150_p5)
}
 0x288   : > { %s1154_s11 = scalar_lea.hbm %s1645_s5, 128 }
 0x289   : > { %p1155_p12 = scmp.ne.s32.totalorder %s1645_s5, %s1154_s11  ;;  %p1160_p8 = scmp.lt.u32.totalorder %s1154_s11, %s1645_s5 }
 0x28b   : > { %p1156_p1 = pnand %p1155_p12, %p988_p11 }
 0x28d   : > { %p1157_p7 = pneg %p1156_p1 }
 0x28f   : > { %p1162_p9 = pnand %p1160_p8, %p1157_p7 }
 0x291   : > { %1165 = shalt.err (!%p1162_p9)
}
 0x292   : > { %967 = dma.vmem_to_hbm [thread:$0]  (%p988_p11), %s671_s8, 128, %s1645_s5, [#allocation5]  }
 0x293   : > { %s1166_s28 = scalar_lea.vmem %s1571_s0, 128  ;;  %p1173_p3 = scmp.lt.s32.totalorder %s1571_s0, %s1571_s0 }
 0x294   : > { %p1167_p10 = scmp.ne.s32.totalorder %s1571_s0, %s1166_s28  ;;  %p1174_p0 = scmp.lt.s32.totalorder %s1166_s28, %s1166_s28 }
 0x296   : > { %p1168_p13 = pnand %p1167_p10, %p988_p11  ;;  %p1175_p6 = por %p1174_p0, %p1173_p3 }
 0x298   : > { %p1169_p2 = pneg %p1168_p13 }
 0x29a   : > { %p1176_p4 = pnand %p1175_p6, %p1169_p2 }
 0x29c   : > { %1179 = shalt.err (!%p1176_p4)
}
 0x29d   : > { %s1180_s7 = scalar_lea.hbm %s1646_s6, 128 }
 0x29e   : > { %p1181_p5 = scmp.ne.s32.totalorder %s1646_s6, %s1180_s7  ;;  %p1186_p7 = scmp.lt.u32.totalorder %s1180_s7, %s1646_s6 }
 0x2a0   : > { %p1182_p12 = pnand %p1181_p5, %p988_p11 }
 0x2a2   : > { %p1183_p1 = pneg %p1182_p12 }
 0x2a4   : > { %p1188_p8 = pnand %p1186_p7, %p1183_p1 }
 0x2a6   : > { %1191 = shalt.err (!%p1188_p8)
}
 0x2a7   : > { %969 = dma.vmem_to_hbm [thread:$0]  (%p988_p11), %s1571_s0, 128, %s1646_s6, [#allocation11]  }
 0x2a8   : > { %1229 = dma.done.wait (%p988_p11), [#allocation5], 128  }
 0x2a9   : > { %1231 = vsyncadd (%p988_p11), [#allocation5], 4294967168 }
 0x2aa   : > { %1233 = dma.done.wait (%p988_p11), [#allocation11], 128  }
 0x2ab   : > { %1235 = vsyncadd (%p988_p11), [#allocation11], 4294967168 }
 0x2ac PF: > { %s25_s26 = sadd.s32 1, %s1258_s26   ;;  %s1660_s21 = smov %s1242_s22 }
 0x2ad   : > { %p22_p9 = scmp.ge.s32.totalorder %s25_s26, 4   ;;  %s1661_s22 = smov %s1246_s23 }
 0x2ae   : > { %s1662_s23 = smov %s1394_s13  ;;  %s1663_s24 = smov %s1254_s25 }
 0x2af   : > { %s1664_s25 = smov %s1666_s9  ;;  %24 = sbr.rel (!%p22_p9) target bundleno = 10 (0xa), region = 112 }
 0x2b6   :  { %700 = vsyncpa [#allocation4], 1 }
 0x2b7   :  { %702 = vsyncpa [#allocation4 + $0x1], 1 }
 0x2b8   :  { %703 = vsyncpa [#allocation7], 1 }
 0x2b9   :  { %705 = vsyncpa [#allocation7 + $0x1], 1 }
 0x2ba   :  { %706 = vsyncpa [#allocation5], 1 }
 0x2bb   :  { %708 = vsyncpa [#allocation5 + $0x1], 1 }
 0x2bc   :  { %709 = vsyncpa [#allocation11], 1 }

</bundles_post_ra>
